<compile_context>
chip_gen: v7x
topology: tpu7x:2x2x1
jax: 0.10.0
libtpu: 0.0.40
codegen_flags: <defaults>
</compile_context>

<pallas_src>
import functools

import jax
import jax.numpy as jnp
from jax import lax
from jax.experimental import pallas as pl
from jax.experimental.pallas import tpu as pltpu


def _round_up(a, b):
    return (a + b - 1) // b * b


def _cdiv(a, b):
    return (a + b - 1) // b


def _tpu_defaults():
    """Generation-aware (block_rows, block_cols, vmem_limit_bytes, num_cores_hint)."""
    vmem_cap = None
    try:
        vmem_cap = int(pltpu.get_tpu_info().vmem_capacity_bytes)
    except Exception:
        vmem_cap = None
    if vmem_cap is None:
        # Unknown part: settings that are safe on any generation.
        return 512, 256, 40 * 1024 * 1024, 2
    if vmem_cap <= 80 * 1024 * 1024:
        # v7x-like: 64 MiB VMEM per TensorCore, 2 TCs/chip, high HBM bandwidth.
        return 512, 256, 44 * 1024 * 1024, 2
    # v5e / v6e-like: 128 MiB VMEM, single TensorCore, needs bigger TM to be MXU-bound.
    return 1024, 256, 96 * 1024 * 1024, 1


def _single_buffered_spec(shape, index_map):
    """Row-tile BlockSpec, single-buffered when the running JAX supports it."""
    if hasattr(pl, "Buffered"):
        try:
            return pl.BlockSpec(shape, index_map, pipeline_mode=pl.Buffered(1)), True
        except TypeError:
            pass
    return pl.BlockSpec(shape, index_map), False


def _ln_linear_kernel(x_ref, g_ref, wt_ref, b_ref, o_ref, xhat_ref, *, eps):
    # x_ref:    (TM, H)  input row tile, resident across the whole j sweep
    # g_ref:    (1, H)   LayerNorm gamma (f32), resident for the whole grid
    # wt_ref:   (H, TN)  W^T column tile (linear weight's native dtype)
    # b_ref:    (1, TN)  linear bias tile (f32)
    # o_ref:    (TM, TN) output tile
    # xhat_ref: (TM, H)  VMEM scratch: normalized + gamma-scaled rows, weight dtype
    j = pl.program_id(1)

    # NOTE: the xhat scratch written at j == 0 is reused by every later j tile of the
    # same row tile.  This is only valid because j is the innermost grid axis, marked
    # "arbitrary" (sequential), and VMEM scratch persists across grid steps per core.
    # Do NOT reorder the grid or mark j "parallel".
    @pl.when(j == 0)
    def _():
        x = x_ref[...].astype(jnp.float32)
        # Two-pass LayerNorm statistics in f32 (matches the reference numerics and
        # avoids E[x^2]-mean^2 cancellation).  Cheap: once per row tile, VPU-only.
        mean = jnp.mean(x, axis=-1, keepdims=True)
        xc = x - mean
        var = jnp.mean(xc * xc, axis=-1, keepdims=True)
        rstd = lax.rsqrt(var + eps)
        xhat_ref[...] = (xc * rstd * g_ref[...]).astype(xhat_ref.dtype)

    # One MXU matmul per (i, j) tile, f32 accumulation, f32 bias add.
    out = jnp.dot(xhat_ref[...], wt_ref[...], preferred_element_type=jnp.float32)
    out = out + b_ref[...]
    o_ref[...] = out.astype(o_ref.dtype)


def layer_norm_linear_pallas(x, norm_weight, linear_weight, linear_bias=None,
                             *, eps=1e-5, block_rows=None, block_cols=None):
    """Fused LayerNorm -> Linear forward.

    x: (..., H); norm_weight: (H,) or None; linear_weight: (O, H);
    linear_bias: (O,) or None.  Returns (..., O) in x.dtype.
    """
    orig_shape = x.shape
    H = orig_shape[-1]
    O = linear_weight.shape[0]
    x2 = x.reshape(-1, H)
    T = x2.shape[0]

    def_rows, def_cols, vmem_limit, n_cores = _tpu_defaults()
    block_rows = def_rows if block_rows is None else block_rows
    block_cols = def_cols if block_cols is None else block_cols

    # Layout plumbing only: W^T for MXU-friendly (H, TN) tiles.  gamma stays a
    # separate in-kernel input (no wrapper-side weight rescale).
    wt = jnp.transpose(linear_weight)  # (H, O), native dtype
    g = (jnp.ones((H,), jnp.float32) if norm_weight is None
         else norm_weight.astype(jnp.float32)).reshape(1, H)
    b = (jnp.zeros((O,), jnp.float32) if linear_bias is None
         else linear_bias.astype(jnp.float32)).reshape(1, O)

    # Row tile: big enough to amortize the per-row-tile (H, O) weight re-stream, but
    # capped so every TensorCore gets at least one row tile on 2-core parts.
    TM = min(block_rows, _round_up(T, 8))
    if n_cores > 1 and T > 8:
        TM = min(TM, _round_up(_cdiv(T, n_cores), 8))
    # Output-column tile: always lane-dense (multiple of 128), pad O up if needed.
    TN = min(_round_up(block_cols, 128), _round_up(O, 128))

    # Shrink tiles if the estimated VMEM footprint would exceed the budget.
    x_bytes = x.dtype.itemsize
    w_bytes = wt.dtype.itemsize
    o_bytes = x.dtype.itemsize

    def vmem_use(tm, tn):
        return (tm * H * x_bytes          # x row tile (single-buffered)
                + 2 * H * tn * w_bytes    # W^T tile (double-buffered)
                + 2 * tm * tn * o_bytes   # output tile (double-buffered)
                + tm * H * w_bytes        # xhat scratch
                + 2 * (H + tn) * 4)       # gamma + bias (tiny)

    budget = int(vmem_limit * 0.8)
    while vmem_use(TM, TN) > budget and (TM > 256 or TN > 128):
        if TM > 256:
            TM = _round_up(max(256, TM // 2), 8)
        else:
            TN = max(128, TN // 2)

    T_pad = _round_up(T, TM)
    O_pad = _round_up(O, TN)
    if T_pad != T:
        x2 = jnp.pad(x2, ((0, T_pad - T), (0, 0)))
    if O_pad != O:
        wt = jnp.pad(wt, ((0, 0), (0, O_pad - O)))
        b = jnp.pad(b, ((0, 0), (0, O_pad - O)))

    grid = (T_pad // TM, O_pad // TN)
    kernel = functools.partial(_ln_linear_kernel, eps=eps)
    x_spec, x_buffered = _single_buffered_spec((TM, H), lambda i, j: (i, 0))

    def _call(x_block_spec):
        return pl.pallas_call(
            kernel,
            out_shape=jax.ShapeDtypeStruct((T_pad, O_pad), x.dtype),
            grid_spec=pltpu.PrefetchScalarGridSpec(
                num_scalar_prefetch=0,
                grid=grid,
                in_specs=[
                    # Input rows: block index changes only with i.
                    x_block_spec,
                    # LayerNorm gamma (f32), resident for the whole grid.
                    pl.BlockSpec((1, H), lambda i, j: (0, 0)),
                    # W^T, tiled along the output dimension (lane-dense).
                    pl.BlockSpec((H, TN), lambda i, j: (0, j)),
                    # Linear bias tile (f32, pre-cast in the wrapper).
                    pl.BlockSpec((1, TN), lambda i, j: (0, j)),
                ],
                out_specs=pl.BlockSpec((TM, TN), lambda i, j: (i, j)),
                scratch_shapes=[pltpu.VMEM((TM, H), wt.dtype)],
            ),
            compiler_params=pltpu.CompilerParams(
                # i (rows) shards across TensorCores; j MUST stay sequential
                # ("arbitrary") so the xhat scratch written at j == 0 is valid for
                # every later j tile of the same row tile.
                dimension_semantics=("parallel", "arbitrary"),
                vmem_limit_bytes=int(vmem_limit),
            ),
        )(x2, g, wt, b)

    try:
        out = _call(x_spec)
    except Exception:
        if not x_buffered:
            raise
        # Fall back to the default double-buffered row tile if single-buffering
        # is rejected by this JAX/Mosaic version.
        out = _call(pl.BlockSpec((TM, H), lambda i, j: (i, 0)))

    out = out[:T, :O]
    return out.reshape(*orig_shape[:-1], O)


def _reference(x, norm_weight, linear_weight, linear_bias, eps=1e-5):
    xf = x.astype(jnp.float32)
    mean = jnp.mean(xf, axis=-1, keepdims=True)
    xbar = xf - mean
    var = jnp.mean(xbar * xbar, axis=-1, keepdims=True)
    y = xbar * lax.rsqrt(var + eps)
    if norm_weight is not None:
        y = y * norm_weight.astype(jnp.float32)
    out = y @ linear_weight.T.astype(jnp.float32)
    if linear_bias is not None:
        out = out + linear_bias.astype(jnp.float32)
    return out.astype(x.dtype)


if __name__ == "__main__":
    key = jax.random.PRNGKey(0)
    B, S, H, O = 2, 8, 32, 64

    kx, kw, kb = jax.random.split(key, 3)
    x = jax.random.normal(kx, (B, S, H), dtype=jnp.float32)
    # LayerNormLinear.__init__: weight = ones(hidden_size), norm bias = None (bias=False default)
    norm_weight = jnp.ones((H,), dtype=jnp.float32)
    # Linear weight/bias are passed to forward(); init deterministically here.
    linear_weight = jax.random.normal(kw, (O, H), dtype=jnp.float32) * 0.05
    linear_bias = jax.random.normal(kb, (O,), dtype=jnp.float32) * 0.01

    out = layer_norm_linear_pallas(x, norm_weight, linear_weight, linear_bias, eps=1e-5)
    out = jax.block_until_ready(out)

    ref = _reference(x, norm_weight, linear_weight, linear_bias, eps=1e-5)
    assert out.shape == (B, S, O)
    # Tolerance accounts for the TPU MXU's default f32 matmul precision (bf16 passes)
    # in both the kernel and the XLA reference matmul.
    assert jnp.allclose(out, ref, atol=1e-2, rtol=1e-2), "mismatch vs reference"

    print("KERNEL_OK")
</pallas_src>

<mosaic_0001>
module attributes {stable_mosaic.version = 11 : i64} {
  func.func @_ln_linear_kernel(%arg0: i32, %arg1: i32, %arg2: memref<8x32xf32, #tpu.memory_space<vmem>>, %arg3: memref<1x32xf32, #tpu.memory_space<vmem>>, %arg4: memref<32x128xf32, #tpu.memory_space<vmem>>, %arg5: memref<1x128xf32, #tpu.memory_space<vmem>>, %arg6: memref<8x128xf32, #tpu.memory_space<vmem>>, %arg7: memref<8x32xf32, #tpu.memory_space<vmem>>) attributes {dimension_semantics = [#tpu.dimension_semantics<parallel>, #tpu.dimension_semantics<arbitrary>], iteration_bounds = array<i64: 2, 1>, scalar_prefetch = 0 : i64, scratch_operands = 1 : i64, tpu.core_type = #tpu.core_type<tc>, window_params = [{pipeline_mode = #tpu.pipeline_mode<synchronous>, transform_indices = @transform_0, window_bounds = array<i64: 8, 32>}, {pipeline_mode = #tpu.pipeline_mode<synchronous>, transform_indices = @transform_1, window_bounds = array<i64: 1, 32>}, {transform_indices = @transform_2, window_bounds = array<i64: 32, 128>}, {transform_indices = @transform_3, window_bounds = array<i64: 1, 128>}, {transform_indices = @transform_4, window_bounds = array<i64: 8, 128>}]} {
    %c0_i32 = arith.constant 0 : i32
    %0 = arith.cmpi eq, %arg1, %c0_i32 : i32
    %1 = arith.extui %0 : i1 to i32
    %c0_i32_0 = arith.constant 0 : i32
    %2 = arith.cmpi ne, %1, %c0_i32_0 : i32
    scf.if %2 {
      %c0_8 = arith.constant 0 : index
      %c0_9 = arith.constant 0 : index
      %10 = vector.load %arg2[%c0_8, %c0_9] : memref<8x32xf32, #tpu.memory_space<vmem>>, vector<8x32xf32>
      %cst_10 = arith.constant dense<0.000000e+00> : vector<8xf32>
      %11 = vector.multi_reduction <add>, %10, %cst_10 [1] : vector<8x32xf32> to vector<8xf32>
      %12 = vector.shape_cast %11 : vector<8xf32> to vector<8x1xf32>
      %cst_11 = arith.constant 3.200000e+01 : f32
      %13 = vector.broadcast %cst_11 : f32 to vector<8x1xf32>
      %14 = arith.divf %12, %13 : vector<8x1xf32>
      %15 = vector.broadcast %14 : vector<8x1xf32> to vector<8x32xf32>
      %16 = arith.subf %10, %15 : vector<8x32xf32>
      %17 = arith.mulf %16, %16 : vector<8x32xf32>
      %cst_12 = arith.constant dense<0.000000e+00> : vector<8xf32>
      %18 = vector.multi_reduction <add>, %17, %cst_12 [1] : vector<8x32xf32> to vector<8xf32>
      %19 = vector.shape_cast %18 : vector<8xf32> to vector<8x1xf32>
      %cst_13 = arith.constant 3.200000e+01 : f32
      %20 = vector.broadcast %cst_13 : f32 to vector<8x1xf32>
      %21 = arith.divf %19, %20 : vector<8x1xf32>
      %cst_14 = arith.constant 9.99999974E-6 : f32
      %22 = vector.broadcast %cst_14 : f32 to vector<8x1xf32>
      %23 = arith.addf %21, %22 : vector<8x1xf32>
      %24 = math.rsqrt %23 : vector<8x1xf32>
      %25 = vector.broadcast %24 : vector<8x1xf32> to vector<8x32xf32>
      %26 = arith.mulf %16, %25 : vector<8x32xf32>
      %c0_15 = arith.constant 0 : index
      %c0_16 = arith.constant 0 : index
      %27 = vector.load %arg3[%c0_15, %c0_16] : memref<1x32xf32, #tpu.memory_space<vmem>>, vector<1x32xf32>
      %28 = vector.broadcast %27 : vector<1x32xf32> to vector<8x32xf32>
      %29 = arith.mulf %26, %28 : vector<8x32xf32>
      %c0_17 = arith.constant 0 : index
      %c0_18 = arith.constant 0 : index
      %30 = vector.load %arg7[%c0_17, %c0_18] : memref<8x32xf32, #tpu.memory_space<vmem>>, vector<8x32xf32>
      tpu.vector_store %arg7[%c0_17, %c0_18], %29 {strides = array<i32>} : memref<8x32xf32, #tpu.memory_space<vmem>>, vector<8x32xf32>,
    } else {
    }
    %c0 = arith.constant 0 : index
    %c0_1 = arith.constant 0 : index
    %3 = vector.load %arg7[%c0, %c0_1] : memref<8x32xf32, #tpu.memory_space<vmem>>, vector<8x32xf32>
    %c0_2 = arith.constant 0 : index
    %c0_3 = arith.constant 0 : index
    %4 = vector.load %arg4[%c0_2, %c0_3] : memref<32x128xf32, #tpu.memory_space<vmem>>, vector<32x128xf32>
    %cst = arith.constant dense<0.000000e+00> : vector<8x128xf32>
    %5 = tpu.matmul %3, %4, %cst {dimension_numbers = #tpu.dot_dimension_numbers<[1], [0], [0], [1], [0, 0, 1, 1], [], []>} : vector<8x32xf32>, vector<32x128xf32>, vector<8x128xf32> -> vector<8x128xf32>
    %c0_4 = arith.constant 0 : index
    %c0_5 = arith.constant 0 : index
    %6 = vector.load %arg5[%c0_4, %c0_5] : memref<1x128xf32, #tpu.memory_space<vmem>>, vector<1x128xf32>
    %7 = vector.broadcast %6 : vector<1x128xf32> to vector<8x128xf32>
    %8 = arith.addf %5, %7 : vector<8x128xf32>
    %c0_6 = arith.constant 0 : index
    %c0_7 = arith.constant 0 : index
    %9 = vector.load %arg6[%c0_6, %c0_7] : memref<8x128xf32, #tpu.memory_space<vmem>>, vector<8x128xf32>
    tpu.vector_store %arg6[%c0_6, %c0_7], %8 {strides = array<i32>} : memref<8x128xf32, #tpu.memory_space<vmem>>, vector<8x128xf32>,
    return
  }
  func.func @transform_0(%arg0: i32, %arg1: i32) -> (i32, i32) {
    %c0_i32 = arith.constant 0 : i32
    %c0_i32_0 = arith.constant 0 : i32
    return %arg0, %c0_i32 : i32, i32
  }
  func.func @transform_1(%arg0: i32, %arg1: i32) -> (i32, i32) {
    %c0_i32 = arith.constant 0 : i32
    %c0_i32_0 = arith.constant 0 : i32
    %c0_i32_1 = arith.constant 0 : i32
    return %c0_i32, %c0_i32_0 : i32, i32
  }
  func.func @transform_2(%arg0: i32, %arg1: i32) -> (i32, i32) {
    %c0_i32 = arith.constant 0 : i32
    %c0_i32_0 = arith.constant 0 : i32
    return %c0_i32, %arg1 : i32, i32
  }
  func.func @transform_3(%arg0: i32, %arg1: i32) -> (i32, i32) {
    %c0_i32 = arith.constant 0 : i32
    %c0_i32_0 = arith.constant 0 : i32
    return %c0_i32, %arg1 : i32, i32
  }
  func.func @transform_4(%arg0: i32, %arg1: i32) -> (i32, i32) {
    %c0_i32 = arith.constant 0 : i32
    return %arg0, %arg1 : i32, i32
  }
}

module attributes {stable_mosaic.version = 11 : i64} {
  func.func @_ln_linear_kernel(%arg0: i32, %arg1: i32, %arg2: memref<8x32xf32, #tpu.memory_space<vmem>>, %arg3: memref<1x32xf32, #tpu.memory_space<vmem>>, %arg4: memref<32x128xf32, #tpu.memory_space<vmem>>, %arg5: memref<1x128xf32, #tpu.memory_space<vmem>>, %arg6: memref<8x128xf32, #tpu.memory_space<vmem>>, %arg7: memref<8x32xf32, #tpu.memory_space<vmem>>) attributes {dimension_semantics = [#tpu.dimension_semantics<parallel>, #tpu.dimension_semantics<arbitrary>], iteration_bounds = array<i64: 2, 1>, scalar_prefetch = 0 : i64, scratch_operands = 1 : i64, tpu.core_type = #tpu.core_type<tc>, window_params = [{transform_indices = @transform_0, window_bounds = array<i64: 8, 32>}, {pipeline_mode = #tpu.pipeline_mode<synchronous>, transform_indices = @transform_1, window_bounds = array<i64: 1, 32>}, {transform_indices = @transform_2, window_bounds = array<i64: 32, 128>}, {transform_indices = @transform_3, window_bounds = array<i64: 1, 128>}, {transform_indices = @transform_4, window_bounds = array<i64: 8, 128>}]} {
    %c0_i32 = arith.constant 0 : i32
    %0 = arith.cmpi eq, %arg1, %c0_i32 : i32
    %1 = arith.extui %0 : i1 to i32
    %c0_i32_0 = arith.constant 0 : i32
    %2 = arith.cmpi ne, %1, %c0_i32_0 : i32
    scf.if %2 {
      %c0_8 = arith.constant 0 : index
      %c0_9 = arith.constant 0 : index
      %10 = vector.load %arg2[%c0_8, %c0_9] : memref<8x32xf32, #tpu.memory_space<vmem>>, vector<8x32xf32>
      %cst_10 = arith.constant dense<0.000000e+00> : vector<8xf32>
      %11 = vector.multi_reduction <add>, %10, %cst_10 [1] : vector<8x32xf32> to vector<8xf32>
      %12 = vector.shape_cast %11 : vector<8xf32> to vector<8x1xf32>
      %cst_11 = arith.constant 3.200000e+01 : f32
      %13 = vector.broadcast %cst_11 : f32 to vector<8x1xf32>
      %14 = arith.divf %12, %13 : vector<8x1xf32>
      %15 = vector.broadcast %14 : vector<8x1xf32> to vector<8x32xf32>
      %16 = arith.subf %10, %15 : vector<8x32xf32>
      %17 = arith.mulf %16, %16 : vector<8x32xf32>
      %cst_12 = arith.constant dense<0.000000e+00> : vector<8xf32>
      %18 = vector.multi_reduction <add>, %17, %cst_12 [1] : vector<8x32xf32> to vector<8xf32>
      %19 = vector.shape_cast %18 : vector<8xf32> to vector<8x1xf32>
      %cst_13 = arith.constant 3.200000e+01 : f32
      %20 = vector.broadcast %cst_13 : f32 to vector<8x1xf32>
      %21 = arith.divf %19, %20 : vector<8x1xf32>
      %cst_14 = arith.constant 9.99999974E-6 : f32
      %22 = vector.broadcast %cst_14 : f32 to vector<8x1xf32>
      %23 = arith.addf %21, %22 : vector<8x1xf32>
      %24 = math.rsqrt %23 : vector<8x1xf32>
      %25 = vector.broadcast %24 : vector<8x1xf32> to vector<8x32xf32>
      %26 = arith.mulf %16, %25 : vector<8x32xf32>
      %c0_15 = arith.constant 0 : index
      %c0_16 = arith.constant 0 : index
      %27 = vector.load %arg3[%c0_15, %c0_16] : memref<1x32xf32, #tpu.memory_space<vmem>>, vector<1x32xf32>
      %28 = vector.broadcast %27 : vector<1x32xf32> to vector<8x32xf32>
      %29 = arith.mulf %26, %28 : vector<8x32xf32>
      %c0_17 = arith.constant 0 : index
      %c0_18 = arith.constant 0 : index
      %30 = vector.load %arg7[%c0_17, %c0_18] : memref<8x32xf32, #tpu.memory_space<vmem>>, vector<8x32xf32>
      tpu.vector_store %arg7[%c0_17, %c0_18], %29 {strides = array<i32>} : memref<8x32xf32, #tpu.memory_space<vmem>>, vector<8x32xf32>,
    } else {
    }
    %c0 = arith.constant 0 : index
    %c0_1 = arith.constant 0 : index
    %3 = vector.load %arg7[%c0, %c0_1] : memref<8x32xf32, #tpu.memory_space<vmem>>, vector<8x32xf32>
    %c0_2 = arith.constant 0 : index
    %c0_3 = arith.constant 0 : index
    %4 = vector.load %arg4[%c0_2, %c0_3] : memref<32x128xf32, #tpu.memory_space<vmem>>, vector<32x128xf32>
    %cst = arith.constant dense<0.000000e+00> : vector<8x128xf32>
    %5 = tpu.matmul %3, %4, %cst {dimension_numbers = #tpu.dot_dimension_numbers<[1], [0], [0], [1], [0, 0, 1, 1], [], []>} : vector<8x32xf32>, vector<32x128xf32>, vector<8x128xf32> -> vector<8x128xf32>
    %c0_4 = arith.constant 0 : index
    %c0_5 = arith.constant 0 : index
    %6 = vector.load %arg5[%c0_4, %c0_5] : memref<1x128xf32, #tpu.memory_space<vmem>>, vector<1x128xf32>
    %7 = vector.broadcast %6 : vector<1x128xf32> to vector<8x128xf32>
    %8 = arith.addf %5, %7 : vector<8x128xf32>
    %c0_6 = arith.constant 0 : index
    %c0_7 = arith.constant 0 : index
    %9 = vector.load %arg6[%c0_6, %c0_7] : memref<8x128xf32, #tpu.memory_space<vmem>>, vector<8x128xf32>
    tpu.vector_store %arg6[%c0_6, %c0_7], %8 {strides = array<i32>} : memref<8x128xf32, #tpu.memory_space<vmem>>, vector<8x128xf32>,
    return
  }
  func.func @transform_0(%arg0: i32, %arg1: i32) -> (i32, i32) {
    %c0_i32 = arith.constant 0 : i32
    %c0_i32_0 = arith.constant 0 : i32
    return %arg0, %c0_i32 : i32, i32
  }
  func.func @transform_1(%arg0: i32, %arg1: i32) -> (i32, i32) {
    %c0_i32 = arith.constant 0 : i32
    %c0_i32_0 = arith.constant 0 : i32
    %c0_i32_1 = arith.constant 0 : i32
    return %c0_i32, %c0_i32_0 : i32, i32
  }
  func.func @transform_2(%arg0: i32, %arg1: i32) -> (i32, i32) {
    %c0_i32 = arith.constant 0 : i32
    %c0_i32_0 = arith.constant 0 : i32
    return %c0_i32, %arg1 : i32, i32
  }
  func.func @transform_3(%arg0: i32, %arg1: i32) -> (i32, i32) {
    %c0_i32 = arith.constant 0 : i32
    %c0_i32_0 = arith.constant 0 : i32
    return %c0_i32, %arg1 : i32, i32
  }
  func.func @transform_4(%arg0: i32, %arg1: i32) -> (i32, i32) {
    %c0_i32 = arith.constant 0 : i32
    return %arg0, %arg1 : i32, i32
  }
}

</mosaic_0001>

<bundles_post_ra>
// kernel: tpu_custom_call.1
= control target key start
LH: loop header
LB: loop body
LE: loop exit
PB: predicated region body
PF: predicated region fallthrough
CT: control target
= control target key end

     0   :  { %9 = vsyncpa [#allocation4], 0  ;;  %s981_s0 = inlined_call_operand.hbm [shape: f32[16,32], index: 0, kind: input, shape index: {}]   ;;  %s982_s1 = inlined_call_operand.vmem [shape: f32[1,32], index: 1, kind: input, shape index: {}]   ;;  %s983_s2 = inlined_call_operand.hbm [shape: f32[32,128], index: 2, kind: input, shape index: {}]   ;;  %s984_s3 = inlined_call_operand.vmem [shape: f32[1,128], index: 3, kind: input, shape index: {}]   ;;  %s985_s4 = inlined_call_operand.hbm [shape: f32[16,128], index: 4, kind: output, shape index: {}]  }
   0x1   :  { %10 = vsyncpa [#allocation7], 0 }
   0x2   :  { %11 = vsyncpa [#allocation5], 0 }
   0x3   :  { %13 = vsyncpa [#allocation5 + $0x1], 0  ;;  %s767_s15 = smov 0   ;;  %s769_s16 = smov 0  }
   0x4   :  { %s771_s17 = smov 0   ;;  %s773_s18 = smov 0  }
   0x5   :  { %s775_s19 = smov 0   ;;  %s777_s20 = smov 0  }
   0x6 LB: > { %s471_s21 = sadd.s32 4294967295, %s732_s20   ;;  %s472_s22 = sadd.s32 4294967294, %s732_s20   ;;  %s732_s20 = sphi %s777_s20, %s19_s20   ;;  %s728_s19 = sphi %s775_s19, %s1010_s19   ;;  %s724_s18 = sphi %s773_s18, %s1009_s18   ;;  %s720_s17 = sphi %s771_s17, %s1008_s17   ;;  %s716_s16 = sphi %s769_s16, %s1007_s16   ;;  %s712_s15 = sphi %s767_s15, %s1006_s15  }
   0x7   : > { %s31_s23 = sadd.s32 1, %s728_s19  ;;  %s38_s24 = sadd.s32 1, %s720_s17 }
   0x8   : > { %p33_p0 = scmp.ge.s32.totalorder %s31_s23, 2  ;;  %p51_p1 = scmp.ne.s32.totalorder %s716_s16, %s712_s15 }
   0x9   : > { %p149_p2 = scmp.ne.s32.totalorder %s720_s17, %s716_s16  ;;  %p807_p3 = scmp.eq.s32.totalorder %s471_s21, 0 }
   0xa   : > { %s1012_s23 = smov (%p33_p0, %s31_s23), 0  ;;  %p150_p4 = scmp.eq.s32.totalorder %s471_s21, 1 }
   0xb   : > { %s993_s25 = scalar_select %p807_p3, 1, 0 }
   0xc   : > { %s35_s26 = ssub.s32 %s728_s19, %s1012_s23  ;;  %p156_p5 = scmp.eq.s32.totalorder %s472_s22, 1 }
   0xd   : > { %p36_p6 = scmp.eq.s32.totalorder %s35_s26, 0  ;;  %p813_p7 = por %p150_p4, %p149_p2 }
   0xe   : > { %p820_p8 = por %p156_p5, %p51_p1  ;;  %p473_p9 = scmp.ge.s32.totalorder %s732_s20, 1 }
   0xf   : > { %s994_s27 = scalar_select %p813_p7, 1, 0 }
  0x10   : > { %s995_s28 = scalar_select %p820_p8, 1, 0 }
  0x11   : > { %s826_s29 = scalar_select %p36_p6, %s720_s17, %s38_s24  }
  0x12   : > { %p163_p10 = scmp.lt.s32.totalorder %s732_s20, 3  ;;  %s474_s30 = sshll.u32 %s724_s18, 7 }
  0x13   : > { %p835_p11 = por %p807_p3, %p51_p1  ;;  %s734_s7 = smov [#allocation3]  }
  0x14   : > { %p839_p12 = pnand %p473_p9, %p163_p10  ;;  %s178_s8 = sshll.u32 %s734_s7, 4  ;;  %s179_s8 = int_to_ptr.vmem [resolvable:$true] %s178_s8 }
  0x15   : > { %s996_s5 = scalar_select %p835_p11, 1, 0 }
  0x16   : > { %s997_s6 = scalar_select %p839_p12, 1, 0 }
  0x17   : > { %s848_s11 = scalar_lea.hbm %s981_s0, %s474_s30  ;;  %p517_p13 = pneg %p839_p12 }
  0x18   : > { %s735_s12 = smov [#allocation6]   ;;  %s588_s22 = scalar_lea.hbm %s848_s11, 128 }
  0x19   : > { %s193_s13 = sshll.u32 %s735_s12, 4  ;;  %p854_p0 = pnand %p517_p13, %p835_p11  ;;  %s858_s13 = int_to_ptr.vmem [resolvable:$true] %s193_s13 }
  0x1a   : > { %p862_p1 = pnand %p517_p13, %p807_p3  ;;  %p589_p2 = scmp.ne.s32.totalorder %s848_s11, %s588_s22 }
  0x1b   : > { %p590_p4 = pneg %p854_p0  ;;  %s593_s7 = scalar_lea.hbm %s981_s0, 256 }
  0x1c   : > { %s999_s21 = scalar_select %p862_p1, 1, 0 }
  0x1d   : > { %p591_p5 = pnand %p590_p4, %p589_p2  ;;  %p594_p9 = scmp.lt.u32.totalorder %s848_s11, %s981_s0 }
  0x1e   : > { %p595_p10 = scmp.lt.u32.totalorder %s593_s7, %s588_s22  ;;  %p597_p8 = scmp.lt.u32.totalorder %s588_s22, %s848_s11 }
  0x1f   : > { %p592_p6 = pneg %p591_p5 }
  0x20   : > { %p596_p13 = por %p595_p10, %p594_p9 }
  0x22   : > { %p598_p7 = por %p597_p8, %p596_p13 }
  0x24   : > { %p599_p3 = pnand %p598_p7, %p592_p6 }
  0x26   : > { %602 = shalt.err (!%p599_p3)
}
  0x27   : > { %s603_s12 = scalar_lea.vmem %s179_s8, 128  ;;  %p611_p12 = scmp.lt.s32.totalorder %s179_s8, %s179_s8 }
  0x28   : > { %p604_p11 = scmp.ne.s32.totalorder %s179_s8, %s603_s12  ;;  %p612_p1 = scmp.lt.s32.totalorder %s603_s12, %s603_s12 }
  0x2a   : > { %p606_p2 = pnand %p604_p11, %p590_p4  ;;  %p613_p9 = por %p612_p1, %p611_p12 }
  0x2c   : > { %p607_p5 = pneg %p606_p2 }
  0x2e   : > { %p614_p10 = pnand %p613_p9, %p607_p5 }
  0x30   : > { %617 = shalt.err (!%p614_p10)
}
  0x31   : > { %520 = dma.hbm_to_vmem [thread:$0]  (!%p854_p0), %s848_s11, 128, %s179_s8, [#allocation4]  }
  0x32   : > { %s618_s26 = scalar_lea.hbm %s983_s2, 512  ;;  %p1000_p7 = scmp.ne.s32.totalorder %s999_s21, 0 }
  0x33   : > { %p619_p3 = scmp.ne.s32.totalorder %s983_s2, %s618_s26  ;;  %p625_p12 = scmp.lt.u32.totalorder %s618_s26, %s983_s2 }
  0x34   : > { %p620_p8 = pneg %p1000_p7 }
  0x36   : > { %p621_p11 = pnand %p620_p8, %p619_p3 }
  0x38   : > { %p622_p4 = pneg %p621_p11 }
  0x3a   : > { %p627_p1 = pnand %p625_p12, %p622_p4 }
  0x3c   : > { %630 = shalt.err (!%p627_p1)
}
  0x3d   : > { %s631_s8 = scalar_lea.vmem %s858_s13, 512  ;;  %p639_p2 = scmp.lt.s32.totalorder %s858_s13, %s858_s13 }
  0x3e   : > { %p632_p0 = scmp.ne.s32.totalorder %s858_s13, %s631_s8  ;;  %p640_p5 = scmp.lt.s32.totalorder %s631_s8, %s631_s8 }
  0x40   : > { %p634_p6 = pnand %p632_p0, %p620_p8  ;;  %p641_p9 = por %p640_p5, %p639_p2 }
  0x42   : > { %p635_p13 = pneg %p634_p6 }
  0x44   : > { %p642_p10 = pnand %p641_p9, %p635_p13 }
  0x46   : > { %645 = shalt.err (!%p642_p10)
}
  0x47   : > { %s736_s11 = smov 128   ;;  %s737_s14 = smov 8  }
  0x48   : > { %523 = dma.hbm_to_vmem [thread:$0]  (!%p1000_p7), %s983_s2, 512, %s858_s13, [#allocation7], %s736_s11, %s736_s11, %s737_s14  }
  0x49   : > { %p1001_p3 = scmp.ne.s32.totalorder %s997_s6, 0 }
  0x4a   : > { %p1002_p8 = scmp.ne.s32.totalorder (!%p1001_p3), %s996_s5, 0 }
  0x4b   : > { %215 = sbr.rel (%p1001_p3) target bundleno = 634 (0x27a), region = 36 }
  0x52   : > { %699 = dma.done.wait (%p1002_p8), [#allocation4], 128  }
  0x53   : > { %701 = vsyncadd (%p1002_p8), [#allocation4], 4294967168  ;;  %p1003_p11 = scmp.ne.s32.totalorder %s993_s25, 0 }
  0x55   : > { %703 = dma.done.wait (%p1003_p11), [#allocation7], 512  }
  0x56   : > { %705 = vsyncadd (%p1003_p11), [#allocation7], 4294966784  ;;  %vm251_vm0 = vcmask 261120   ;;  %v250_v0 = vld [vmem:[#allocation3] sm:$0xff]  ;;  %v276_v7 = vld [vmem:[#allocation6] sm:$0xff]  ;;  %v738_v10 = vmov 0.0|0.0   ;;  %s934_s8 = scalar_lea.hbm %s985_s4, %s474_s30 }
  0x57   : > { %v252_v1 = vsel %vm251_vm0, %v250_v0, 0.0  ;;  %v277_v8 = vld [vmem:[#allocation6 + $0x8] sm:$0xff]  ;;  %503 = vmatprep.subr.bf16.mxu0 %v738_v10  ;;  %v278_v11 = vld [vmem:[#allocation6 + $0x10] sm:$0xff]  ;;  %v279_v12 = vld [vmem:[#allocation6 + $0x18] sm:$0xff]  ;;  %vm739_vm1 = vmmov 0   ;;  %v740_v14 = vmov 0.0  }
  0x58   : > { %253 = vadd.xlane.f32.xlu0 %v252_v1  ;;  %v504_v9 = vpack.c.bf16 %v277_v8, %v276_v7  ;;  %v507_v13 = vpack.c.bf16 %v279_v12, %v278_v11  ;;  %500 = vmatprep.mubr.msk.f32.mxu0 %vm739_vm1, %v740_v14  ;;  %v480_v19 = vld [vmem:[%s982_s1] ss:$0 sm:$0xff]  ;;  %s240_s6 = sand.u32 1, %s716_s16   ;;  %p1004_p4 = scmp.ne.s32.totalorder %s994_s27, 0 }
  0x59   : > { %s479_s13 = sshll.u32 %s240_s6, 3  ;;  %v481_v23 = vld [vmem:[%s984_s3] ss:$0 sm:$0xff]  ;;  %s363_s11 = scalar_lea.sflag [#allocation5], %s240_s6 }
  0x5a   : > { %505 = vmatpush3.bf16.msra.mxu0 %v504_v9  ;;  %s242_s7 = scalar_lea.vmem [#allocation8], %s479_s13  ;;  %s741_s22 = smov [#allocation8]  }
  0x5b   : > { %506 = vmatprep.subr.bf16.mxu0 %v738_v10  ;;  %s377_s9 = sshll.u32 %s242_s7, 4  ;;  %s650_s24 = sshll.u32 %s741_s22, 4  ;;  %s936_s9 = int_to_ptr.vmem [resolvable:$true] %s377_s9  ;;  %s651_s24 = int_to_ptr.vmem [resolvable:$false] %s650_s24 }
  0x5c   : > { %s646_s14 = scalar_lea.vmem %s936_s9, 128  ;;  %s652_s18 = scalar_lea.vmem %s651_s24, 256 }
  0x5d   : > { %p647_p7 = scmp.ne.s32.totalorder %s936_s9, %s646_s14  ;;  %p653_p0 = scmp.lt.s32.totalorder %s936_s9, %s651_s24 }
  0x5e   : > { %508 = vmatpush3.bf16.msra.mxu0 %v507_v13  ;;  %p654_p6 = scmp.lt.s32.totalorder %s652_s18, %s646_s14 }
  0x5f   : > { %p648_p12 = pnand %p647_p7, %p1004_p4 }
  0x60   : > { %p655_p13 = por %p654_p6, %p653_p0 }
  0x61   : > { %p649_p1 = pneg %p648_p12 }
  0x63   : > { %p656_p2 = pnand %p655_p13, %p649_p1 }
  0xe5   : > { %v254_v2 = vpop.xlane.xlu0 %253 }
  0xe6   : > { %v256_v3 = vmul.f32 0.03125, %v254_v2 }
  0xe8   : > { %v257_v4 = vsub.f32 %v250_v0, %v256_v3 }
  0xea   : > { %v258_v5 = vmul.f32 %v257_v4, %v257_v4 }
  0xec   : > { %v259_v6 = vsel %vm251_vm0, %v258_v5, 0.0 }
  0xed   : > { %260 = vadd.xlane.f32.xlu0 %v259_v6 }
 0x17a   : > { %v261_v15 = vpop.xlane.xlu0 %260 }
 0x17b   : > { %v262_v16 = vmul.f32 0.03125, %v261_v15 }
 0x17d   : > { %v263_v17 = vadd.f32 1e-05, %v262_v16 }
 0x17f   : > { %586 = vrsqrt.f32 %v263_v17 }
 0x189   : > { %v587_v18 = vpop.eup %586 }
 0x18a   : > { %v265_v20 = vmul.f32 %v587_v18, %v257_v4 }
 0x18c   : > { %v273_v21 = vmul.f32 %v480_v19, %v265_v20 }
 0x18e   : > { %274 = vst.msk [vmem:[#allocation2] sm:$0xff] %vm251_vm0, %v273_v21 }
 0x195   : > { %v275_v22 = vld [vmem:[#allocation2] sm:$0xff] }
 0x196   : > { %501 = vmatmul.mubr.msk.f32.vlgmr.msra.gmra.mrb[0].mxu0 %vm251_vm0, %v275_v22 }
 0x269   : > { %v357_v24 = vpop.f32.mrb[0].mxu0 }
 0x26a   : > { %v358_v25 = vadd.f32 %v481_v23, %v357_v24  ;;  %v502_v26 = vpop.f32.mrb[1].mxu0 }
 0x26c   : > { %361 = vst [vmem:[%s242_s7] sm:$0xff] %v358_v25 }
 0x26d   : > { %659 = shalt.err (!%p656_p2)
}
 0x26e   : > { %s660_s30 = scalar_lea.hbm %s934_s8, 128  ;;  %s664_s6 = scalar_lea.hbm %s985_s4, 256 }
 0x26f   : > { %p661_p5 = scmp.ne.s32.totalorder %s934_s8, %s660_s30  ;;  %p665_p3 = scmp.lt.u32.totalorder %s934_s8, %s985_s4 }
 0x270   : > { %p666_p8 = scmp.lt.u32.totalorder %s664_s6, %s660_s30  ;;  %p668_p7 = scmp.lt.u32.totalorder %s660_s30, %s934_s8 }
 0x271   : > { %p662_p9 = pnand %p661_p5, %p1004_p4 }
 0x272   : > { %p667_p11 = por %p666_p8, %p665_p3 }
 0x273   : > { %p663_p10 = pneg %p662_p9 }
 0x274   : > { %p669_p12 = por %p668_p7, %p667_p11 }
 0x276   : > { %p670_p1 = pnand %p669_p12, %p663_p10 }
 0x278   : > { %673 = shalt.err (!%p670_p1)
}
 0x279   : > { %515 = dma.vmem_to_hbm [thread:$0]  (%p1004_p4), %s936_s9, 128, %s934_s8, %s363_s11  }
 0x27a PF: > { %p530_p0 = scmp.ge.s32.totalorder %s732_s20, 2  ;;  %s389_s26 = sand.u32 1, %s712_s15  }
 0x27b   : > { %p1005_p6 = scmp.ne.s32.totalorder %s995_s28, 0  ;;  %s390_s7 = scalar_lea.sflag [#allocation5], %s389_s26 }
 0x27d   : > { %p525_p13 = pnand %p530_p0, %p1005_p6 }
 0x27f   : > { %707 = dma.done.wait (!%p525_p13), %s390_s7, 128  }
 0x280   : > { %709 = vsyncadd (!%p525_p13), %s390_s7, 4294967168  ;;  %s19_s20 = sadd.s32 1, %s732_s20   ;;  %s1006_s15 = smov %s716_s16 }
 0x281   : > { %p16_p2 = scmp.ge.s32.totalorder %s19_s20, 4   ;;  %s1007_s16 = smov %s720_s17 }
 0x282   : > { %s1008_s17 = smov %s826_s29  ;;  %s1009_s18 = smov %s728_s19 }
 0x283   : > { %s1010_s19 = smov %s1012_s23  ;;  %18 = sbr.rel (!%p16_p2) target bundleno = 6 (0x6), region = 86 }
 0x28a   :  { %395 = vsyncpa [#allocation4], 1 }
 0x28b   :  { %397 = vsyncpa [#allocation4 + $0x1], 1 }
 0x28c   :  { %398 = vsyncpa [#allocation7], 1 }
 0x28d   :  { %399 = vsyncpa [#allocation5], 1 }
 0x28e   :  { %401 = vsyncpa [#allocation5 + $0x1], 1 }

// kernel: tpu_custom_call.1
= control target key start
LH: loop header
LB: loop body
LE: loop exit
PB: predicated region body
PF: predicated region fallthrough
CT: control target
= control target key end

     0   :  { %9 = vsyncpa [#allocation4], 0  ;;  %s1025_s0 = inlined_call_operand.hbm [shape: f32[16,32], index: 0, kind: input, shape index: {}]   ;;  %s1026_s1 = inlined_call_operand.vmem [shape: f32[1,32], index: 1, kind: input, shape index: {}]   ;;  %s1027_s2 = inlined_call_operand.hbm [shape: f32[32,128], index: 2, kind: input, shape index: {}]   ;;  %s1028_s3 = inlined_call_operand.vmem [shape: f32[1,128], index: 3, kind: input, shape index: {}]   ;;  %s1029_s4 = inlined_call_operand.hbm [shape: f32[16,128], index: 4, kind: output, shape index: {}]  }
   0x1   :  { %11 = vsyncpa [#allocation4 + $0x1], 0 }
   0x2   :  { %12 = vsyncpa [#allocation7], 0 }
   0x3   :  { %13 = vsyncpa [#allocation5], 0 }
   0x4   :  { %15 = vsyncpa [#allocation5 + $0x1], 0  ;;  %s797_s15 = smov 0   ;;  %s799_s16 = smov 0  }
   0x5   :  { %s801_s17 = smov 0   ;;  %s803_s18 = smov 0  }
   0x6   :  { %s805_s19 = smov 0   ;;  %s807_s20 = smov 0  }
   0x7 LB: > { %s497_s21 = sadd.s32 4294967295, %s762_s20   ;;  %s498_s22 = sadd.s32 4294967294, %s762_s20   ;;  %s762_s20 = sphi %s807_s20, %s21_s20   ;;  %s758_s19 = sphi %s805_s19, %s1053_s19   ;;  %s754_s18 = sphi %s803_s18, %s1052_s18   ;;  %s750_s17 = sphi %s801_s17, %s1051_s17   ;;  %s746_s16 = sphi %s799_s16, %s1050_s16   ;;  %s742_s15 = sphi %s797_s15, %s1049_s15  }
   0x8   : > { %p53_p0 = scmp.ne.s32.totalorder %s746_s16, %s742_s15  ;;  %p831_p1 = scmp.eq.s32.totalorder %s497_s21, 0 }
   0x9   : > { %p835_p2 = scmp.eq.s32.totalorder %s497_s21, 1  ;;  %p158_p3 = scmp.eq.s32.totalorder %s498_s22, 1 }
   0xa   : > { %s1034_s23 = scalar_select %p831_p1, 1, 0 }
   0xb   : > { %s1035_s24 = scalar_select %p835_p2, 1, 0 }
   0xc   : > { %p841_p4 = por %p831_p1, %p53_p0  ;;  %p499_p5 = scmp.ge.s32.totalorder %s762_s20, 1 }
   0xd   : > { %p846_p6 = por %p158_p3, %p53_p0  ;;  %p165_p7 = scmp.lt.s32.totalorder %s762_s20, 3 }
   0xe   : > { %s1036_s25 = scalar_select %p841_p4, 1, 0 }
   0xf   : > { %s1037_s26 = scalar_select %p846_p6, 1, 0 }
  0x10   : > { %p851_p8 = pnand %p499_p5, %p165_p7  ;;  %s764_s28 = smov [#allocation6]  }
  0x11   : > { %s182_s29 = sshll.u32 %s764_s28, 4  ;;  %s33_s5 = sadd.s32 1, %s758_s19  ;;  %s183_s29 = int_to_ptr.vmem [resolvable:$true] %s182_s29 }
  0x12   : > { %s1038_s27 = scalar_select %p851_p8, 1, 0 }
  0x13   : > { %p546_p9 = pneg %p851_p8  ;;  %s618_s8 = scalar_lea.hbm %s1027_s2, 512 }
  0x14   : > { %p619_p12 = scmp.ne.s32.totalorder %s1027_s2, %s618_s8  ;;  %p625_p5 = scmp.lt.u32.totalorder %s618_s8, %s1027_s2 }
  0x15   : > { %p860_p11 = pnand %p546_p9, %p831_p1 }
  0x17   : > { %p620_p13 = pneg %p860_p11 }
  0x19   : > { %p621_p0 = pnand %p620_p13, %p619_p12 }
  0x1b   : > { %p622_p3 = pneg %p621_p0 }
  0x1d   : > { %p627_p7 = pnand %p625_p5, %p622_p3 }
  0x1f   : > { %630 = shalt.err (!%p627_p7)
}
  0x20   : > { %s631_s13 = scalar_lea.vmem %s183_s29, 512  ;;  %p639_p1 = scmp.lt.s32.totalorder %s183_s29, %s183_s29 }
  0x21   : > { %p632_p9 = scmp.ne.s32.totalorder %s183_s29, %s631_s13  ;;  %p640_p4 = scmp.lt.s32.totalorder %s631_s13, %s631_s13 }
  0x23   : > { %p634_p10 = pnand %p632_p9, %p620_p13  ;;  %p641_p8 = por %p640_p4, %p639_p1 }
  0x25   : > { %p635_p6 = pneg %p634_p10 }
  0x27   : > { %p642_p2 = pnand %p641_p8, %p635_p6 }
  0x29   : > { %645 = shalt.err (!%p642_p2)
}
  0x2a   : > { %s765_s14 = smov 128   ;;  %s766_s21 = smov 8  }
  0x2b   : > { %549 = dma.hbm_to_vmem [thread:$0]  (!%p860_p11), %s1027_s2, 512, %s183_s29, [#allocation7], %s765_s14, %s765_s14, %s766_s21  }
  0x2c   : > { %p35_p1 = scmp.ge.s32.totalorder %s33_s5, 2  ;;  %s40_s6 = sadd.s32 1, %s750_s17 }
  0x2d   : > { %p47_p2 = scmp.ne.s32.totalorder %s750_s17, %s746_s16  ;;  %p48_p4 = scmp.eq.s32.totalorder %s762_s20, 0 }
  0x2e   : > { %s1055_s5 = smov (%p35_p1, %s33_s5), 0  ;;  %p1041_p8 = scmp.ne.s32.totalorder %s1035_s24, 0 }
  0x2f   : > { %p887_p6 = por %p48_p4, %p47_p2  ;;  %s37_s30 = ssub.s32 %s758_s19, %s1055_s5 }
  0x30   : > { %p893_p10 = por %p1041_p8, %p47_p2  ;;  %p559_p12 = scmp.lt.s32.totalorder %s762_s20, 2 }
  0x31   : > { %p38_p11 = scmp.eq.s32.totalorder %s37_s30, 0  ;;  %s202_s29 = sand.u32 1, %s750_s17  }
  0x32   : > { %s503_s9 = sshll.u32 %s202_s29, 3  ;;  %s504_s11 = sshll.u32 %s758_s19, 7 }
  0x33   : > { %s902_s10 = scalar_select %p38_p11, %s750_s17, %s40_s6  }
  0x34   : > { %s908_s14 = scalar_lea.hbm %s1025_s0, %s504_s11  ;;  %s206_s24 = scalar_lea.vmem [#allocation3], %s503_s9 }
  0x35   : > { %s213_s21 = sshll.u32 %s206_s24, 4  ;;  %p914_p13 = pnand %p559_p12, %p887_p6  ;;  %s910_s21 = int_to_ptr.vmem [resolvable:$true] %s213_s21 }
  0x36   : > { %s203_s28 = scalar_lea.sflag [#allocation4], %s202_s29  ;;  %s646_s6 = scalar_lea.hbm %s908_s14, 128 }
  0x37   : > { %p647_p0 = scmp.ne.s32.totalorder %s908_s14, %s646_s6  ;;  %p648_p3 = pneg %p914_p13 }
  0x38   : > { %s651_s11 = scalar_lea.hbm %s1025_s0, 256  ;;  %p652_p9 = scmp.lt.u32.totalorder %s908_s14, %s1025_s0 }
  0x39   : > { %p649_p5 = pnand %p648_p3, %p647_p0  ;;  %p653_p1 = scmp.lt.u32.totalorder %s651_s11, %s646_s6 }
  0x3a   : > { %p655_p4 = scmp.lt.u32.totalorder %s646_s6, %s908_s14 }
  0x3b   : > { %p650_p7 = pneg %p649_p5  ;;  %p654_p2 = por %p653_p1, %p652_p9 }
  0x3d   : > { %p656_p6 = por %p655_p4, %p654_p2 }
  0x3f   : > { %p657_p8 = pnand %p656_p6, %p650_p7 }
  0x41   : > { %660 = shalt.err (!%p657_p8)
}
  0x42   : > { %s661_s29 = scalar_lea.vmem %s910_s21, 128  ;;  %s767_s13 = smov [#allocation3]  }
  0x43   : > { %p662_p12 = scmp.ne.s32.totalorder %s910_s21, %s661_s29  ;;  %s666_s24 = sshll.u32 %s767_s13, 4  ;;  %s667_s24 = int_to_ptr.vmem [resolvable:$false] %s666_s24 }
  0x44   : > { %s668_s30 = scalar_lea.vmem %s667_s24, 256  ;;  %p669_p5 = scmp.lt.s32.totalorder %s910_s21, %s667_s24 }
  0x45   : > { %p664_p11 = pnand %p662_p12, %p648_p3  ;;  %p670_p9 = scmp.lt.s32.totalorder %s668_s30, %s661_s29 }
  0x47   : > { %p665_p0 = pneg %p664_p11  ;;  %p671_p1 = por %p670_p9, %p669_p5 }
  0x49   : > { %p672_p2 = pnand %p671_p1, %p665_p0 }
  0x4b   : > { %675 = shalt.err (!%p672_p2)
}
  0x4c   : > { %553 = dma.hbm_to_vmem [thread:$0]  (!%p914_p13), %s908_s14, 128, %s910_s21, %s203_s28  }
  0x4d   : > { %p1044_p7 = scmp.ne.s32.totalorder %s1038_s27, 0 }
  0x4e   : > { %s946_s6 = sand.u32 (!%p1044_p7), 1, %s746_s16   ;;  %p1045_p3 = scmp.ne.s32.totalorder (!%p1044_p7), %s1036_s25, 0 }
  0x4f   : > { %222 = sbr.rel (%p1044_p7) target bundleno = 638 (0x27e), region = 36  ;;  %s506_s9 = sshll.u32 (!%p1044_p7), %s946_s6, 3 }
  0x50   : > { %s225_s11 = scalar_lea.sflag (!%p1044_p7), [#allocation4], %s946_s6  ;;  %s228_s7 = scalar_lea.vmem (!%p1044_p7), [#allocation3], %s506_s9 }
  0x56   : > { %729 = dma.done.wait (%p1045_p3), %s225_s11, 128  }
  0x57   : > { %731 = vsyncadd (%p1045_p3), %s225_s11, 4294967168  ;;  %p1046_p13 = scmp.ne.s32.totalorder %s1034_s23, 0 }
  0x59   : > { %733 = dma.done.wait (%p1046_p13), [#allocation7], 512  }
  0x5a   : > { %735 = vsyncadd (%p1046_p13), [#allocation7], 4294966784  ;;  %vm268_vm0 = vcmask 261120   ;;  %v267_v0 = vld [vmem:[%s228_s7] sm:$0xff]  ;;  %v293_v7 = vld [vmem:[#allocation6] sm:$0xff]  ;;  %v768_v10 = vmov 0.0|0.0  }
  0x5b   : > { %v269_v1 = vsel %vm268_vm0, %v267_v0, 0.0  ;;  %v294_v8 = vld [vmem:[#allocation6 + $0x8] sm:$0xff]  ;;  %532 = vmatprep.subr.bf16.mxu0 %v768_v10  ;;  %v295_v11 = vld [vmem:[#allocation6 + $0x10] sm:$0xff]  ;;  %v296_v12 = vld [vmem:[#allocation6 + $0x18] sm:$0xff]  ;;  %vm769_vm1 = vmmov 0   ;;  %v770_v14 = vmov 0.0  }
  0x5c   : > { %270 = vadd.xlane.f32.xlu0 %v269_v1  ;;  %v533_v9 = vpack.c.bf16 %v294_v8, %v293_v7  ;;  %v536_v13 = vpack.c.bf16 %v296_v12, %v295_v11  ;;  %529 = vmatprep.mubr.msk.f32.mxu0 %vm769_vm1, %v770_v14  ;;  %v509_v19 = vld [vmem:[%s1026_s1] ss:$0 sm:$0xff]  ;;  %s513_s21 = sshll.u32 %s754_s18, 7  ;;  %s259_s22 = scalar_lea.vmem [#allocation8], %s506_s9 }
  0x5d   : > { %v510_v23 = vld [vmem:[%s1028_s3] ss:$0 sm:$0xff]  ;;  %s394_s28 = sshll.u32 %s259_s22, 4  ;;  %s976_s13 = scalar_lea.hbm %s1029_s4, %s513_s21  ;;  %s978_s28 = int_to_ptr.vmem [resolvable:$true] %s394_s28 }
  0x5e   : > { %534 = vmatpush3.bf16.msra.mxu0 %v533_v9  ;;  %s380_s24 = scalar_lea.sflag [#allocation5], %s946_s6  ;;  %s676_s30 = scalar_lea.vmem %s978_s28, 128 }
  0x5f   : > { %535 = vmatprep.subr.bf16.mxu0 %v768_v10  ;;  %p677_p4 = scmp.ne.s32.totalorder %s978_s28, %s676_s30  ;;  %s771_s18 = smov [#allocation8]  }
  0x60   : > { %s680_s9 = sshll.u32 %s771_s18, 4  ;;  %s681_s9 = int_to_ptr.vmem [resolvable:$false] %s680_s9 }
  0x61   : > { %p678_p6 = pnand %p677_p4, %p893_p10  ;;  %s682_s11 = scalar_lea.vmem %s681_s9, 256 }
  0x62   : > { %537 = vmatpush3.bf16.msra.mxu0 %v536_v13  ;;  %p683_p12 = scmp.lt.s32.totalorder %s978_s28, %s681_s9  ;;  %p684_p11 = scmp.lt.s32.totalorder %s682_s11, %s676_s30 }
  0x63   : > { %p679_p8 = pneg %p678_p6 }
  0x64   : > { %p685_p0 = por %p684_p11, %p683_p12 }
  0x66   : > { %p686_p5 = pnand %p685_p0, %p679_p8 }
  0xe9   : > { %v271_v2 = vpop.xlane.xlu0 %270 }
  0xea   : > { %v273_v3 = vmul.f32 0.03125, %v271_v2 }
  0xec   : > { %v274_v4 = vsub.f32 %v267_v0, %v273_v3 }
  0xee   : > { %v275_v5 = vmul.f32 %v274_v4, %v274_v4 }
  0xf0   : > { %v276_v6 = vsel %vm268_vm0, %v275_v5, 0.0 }
  0xf1   : > { %277 = vadd.xlane.f32.xlu0 %v276_v6 }
 0x17e   : > { %v278_v15 = vpop.xlane.xlu0 %277 }
 0x17f   : > { %v279_v16 = vmul.f32 0.03125, %v278_v15 }
 0x181   : > { %v280_v17 = vadd.f32 1e-05, %v279_v16 }
 0x183   : > { %616 = vrsqrt.f32 %v280_v17 }
 0x18d   : > { %v617_v18 = vpop.eup %616 }
 0x18e   : > { %v282_v20 = vmul.f32 %v617_v18, %v274_v4 }
 0x190   : > { %v290_v21 = vmul.f32 %v509_v19, %v282_v20 }
 0x192   : > { %291 = vst.msk [vmem:[#allocation2] sm:$0xff] %vm268_vm0, %v290_v21 }
 0x199   : > { %v292_v22 = vld [vmem:[#allocation2] sm:$0xff] }
 0x19a   : > { %530 = vmatmul.mubr.msk.f32.vlgmr.msra.gmra.mrb[0].mxu0 %vm268_vm0, %v292_v22 }
 0x26d   : > { %v374_v24 = vpop.f32.mrb[0].mxu0 }
 0x26e   : > { %v375_v25 = vadd.f32 %v510_v23, %v374_v24  ;;  %v531_v26 = vpop.f32.mrb[1].mxu0 }
 0x270   : > { %378 = vst [vmem:[%s259_s22] sm:$0xff] %v375_v25 }
 0x271   : > { %689 = shalt.err (!%p686_p5)
}
 0x272   : > { %s690_s6 = scalar_lea.hbm %s976_s13, 128  ;;  %s694_s25 = scalar_lea.hbm %s1029_s4, 256 }
 0x273   : > { %p691_p9 = scmp.ne.s32.totalorder %s976_s13, %s690_s6  ;;  %p695_p7 = scmp.lt.u32.totalorder %s976_s13, %s1029_s4 }
 0x274   : > { %p696_p3 = scmp.lt.u32.totalorder %s694_s25, %s690_s6  ;;  %p698_p4 = scmp.lt.u32.totalorder %s690_s6, %s976_s13 }
 0x275   : > { %p692_p1 = pnand %p691_p9, %p893_p10 }
 0x276   : > { %p697_p13 = por %p696_p3, %p695_p7 }
 0x277   : > { %p693_p2 = pneg %p692_p1 }
 0x278   : > { %p699_p6 = por %p698_p4, %p697_p13 }
 0x27a   : > { %p700_p8 = pnand %p699_p6, %p693_p2 }
 0x27c   : > { %703 = shalt.err (!%p700_p8)
}
 0x27d   : > { %544 = dma.vmem_to_hbm [thread:$0]  (%p893_p10), %s978_s28, 128, %s976_s13, %s380_s24  }
 0x27e PF: > { %s406_s21 = sand.u32 1, %s742_s15   ;;  %p1047_p12 = scmp.ne.s32.totalorder %s1037_s26, 0 }
 0x27f   : > { %p1048_p11 = scmp.ge.s32.totalorder %s762_s20, 2  ;;  %s407_s22 = scalar_lea.sflag [#allocation5], %s406_s21 }
 0x281   : > { %p555_p0 = pnand %p1048_p11, %p1047_p12 }
 0x283   : > { %737 = dma.done.wait (!%p555_p0), %s407_s22, 128  }
 0x284   : > { %739 = vsyncadd (!%p555_p0), %s407_s22, 4294967168  ;;  %s21_s20 = sadd.s32 1, %s762_s20   ;;  %s1049_s15 = smov %s746_s16 }
 0x285   : > { %p18_p5 = scmp.ge.s32.totalorder %s21_s20, 4   ;;  %s1050_s16 = smov %s750_s17 }
 0x286   : > { %s1051_s17 = smov %s902_s10  ;;  %s1052_s18 = smov %s758_s19 }
 0x287   : > { %s1053_s19 = smov %s1055_s5  ;;  %20 = sbr.rel (!%p18_p5) target bundleno = 7 (0x7), region = 93 }
 0x28e   :  { %412 = vsyncpa [#allocation4], 1 }
 0x28f   :  { %414 = vsyncpa [#allocation4 + $0x1], 1 }
 0x290   :  { %415 = vsyncpa [#allocation7], 1 }
 0x291   :  { %416 = vsyncpa [#allocation5], 1 }
 0x292   :  { %418 = vsyncpa [#allocation5 + $0x1], 1 }

</bundles_post_ra>
